<compile_context>
chip_gen: v7x
topology: tpu7x:2x2x1
jax: 0.10.0
libtpu: 0.0.40
codegen_flags: <defaults>
</compile_context>

<pallas_src>
from math import log

import jax
import jax.numpy as jnp
from jax.experimental import pallas as pl
from jax.experimental.pallas import tpu as pltpu


# ---------------------------------------------------------------------------
# Tiling helpers
# ---------------------------------------------------------------------------
def _pick_tile(n, pref, step=128):
    """Largest multiple-of-`step` divisor of n that is <= pref (fallback: n)."""
    t = min(pref, n)
    t -= t % step
    while t >= step:
        if n % t == 0:
            return t
        t -= step
    return n


def _pick_row_tile(n, pref):
    """Row tile: divides n, <= pref, and (when possible) leaves >= 2 row tiles
    so the 'parallel' grid axis shards across both v7x TensorCores."""
    if n >= 256:
        pref = min(pref, max(n // 2, 128))
    return _pick_tile(n, pref)


# ---------------------------------------------------------------------------
# Kernel 1: GCNII aggregation + residual (+ partial BN statistics)
# ---------------------------------------------------------------------------
def _make_gcn_kernel(alpha: float, tile_k: int, x_resident: bool):
    alpha = float(alpha)

    def gcn_kernel(adj_ref, xw_ref, x0w_ref, o_ref, sum_ref, sq_ref, acc_ref):
        # adj_ref: (tm, tk)              xw_ref: (N, C) resident or (tk, C) streamed
        # x0w_ref: (tm, C) f32           o_ref:  (tm, C)
        # sum_ref/sq_ref: (1, 1, C) f32  acc_ref: (tm, C) f32 scratch
        k = pl.program_id(1)

        @pl.when(k == 0)
        def _():
            acc_ref[...] = jnp.zeros_like(acc_ref)

        if x_resident:
            start = pl.multiple_of(k * tile_k, tile_k)
            x_blk = xw_ref[pl.ds(start, tile_k), :]
        else:
            x_blk = xw_ref[...]

        # Aggregation: partial adj-tile @ (x@W')-tile, f32 MXU accumulation.
        acc_ref[...] += jnp.dot(adj_ref[...], x_blk,
                                preferred_element_type=jnp.float32)

        @pl.when(k == pl.num_programs(1) - 1)
        def _():
            # Initial-residual mix kept entirely in f32 (VPU epilogue).
            out = (1.0 - alpha) * acc_ref[...] + alpha * x0w_ref[...].astype(jnp.float32)
            o_ref[...] = out.astype(o_ref.dtype)
            # Per-row-tile partial BatchNorm statistics (free XLU/VPU work in a
            # memory-bound epilogue) -> avoids re-reading `hidden` from HBM.
            s = jnp.sum(out, axis=0, keepdims=True)
            q = jnp.sum(out * out, axis=0, keepdims=True)
            sum_ref[...] = s.reshape(1, 1, -1)
            sq_ref[...] = q.reshape(1, 1, -1)

    return gcn_kernel


def gcn_aggregate(adj, xw, x0w, *, alpha, out_dtype,
                  tile_m=1024, tile_k=2048, use_bf16=True):
    """adj [N,N], xw = x @ W' [N,C], x0w = x_0 @ W' [N,C] (both f32)."""
    N, C = xw.shape
    assert adj.shape == (N, N) and x0w.shape == (N, C)

    mm_dtype = jnp.bfloat16 if use_bf16 else jnp.float32
    mm_isz = jnp.dtype(mm_dtype).itemsize

    tile_m = _pick_row_tile(N, tile_m)
    tile_k = _pick_tile(N, tile_k)

    # Hold x@W' fully VMEM-resident when small enough (DMA'd once instead of
    # once per row tile).
    x_resident = (2 * N * C * mm_isz) <= (8 << 20)

    def vmem_bytes(tk):
        return (2 * tile_m * tk * mm_isz                          # adj tiles (dbl buf)
                + 2 * (N * C if x_resident else tk * C) * mm_isz  # x@W'
                + 2 * tile_m * C * 4                              # x0@W' tiles (f32)
                + 2 * tile_m * C * 4                              # hidden out tiles
                + tile_m * C * 4                                  # f32 accumulator
                + 4 * 4 * C * 4)                                  # stats outputs

    # Stay well inside v7x's 64 MiB physical VMEM.
    while vmem_bytes(tile_k) > (40 << 20) and tile_k > 512 and tile_k % 2 == 0:
        tile_k //= 2
    vmem_limit = int(min(max(vmem_bytes(tile_k) + (4 << 20), 16 << 20), 60 << 20))

    grid_m = N // tile_m
    grid_k = N // tile_k

    adj_mm = adj.astype(mm_dtype)
    xw_mm = xw.astype(mm_dtype)

    if x_resident:
        xw_spec = pl.BlockSpec((N, C), lambda i, k: (0, 0))
    else:
        xw_spec = pl.BlockSpec((tile_k, C), lambda i, k: (k, 0))

    kernel = _make_gcn_kernel(alpha, tile_k, x_resident)

    hidden, psum, psq = pl.pallas_call(
        kernel,
        out_shape=(
            jax.ShapeDtypeStruct((N, C), out_dtype),
            jax.ShapeDtypeStruct((grid_m, 1, C), jnp.float32),
            jax.ShapeDtypeStruct((grid_m, 1, C), jnp.float32),
        ),
        grid_spec=pltpu.PrefetchScalarGridSpec(
            num_scalar_prefetch=0,
            grid=(grid_m, grid_k),                    # (row tiles, reduction tiles)
            in_specs=[
                pl.BlockSpec((tile_m, tile_k), lambda i, k: (i, k)),   # adj tile
                xw_spec,                                               # x@W'
                pl.BlockSpec((tile_m, C), lambda i, k: (i, 0)),        # x_0@W' rows
            ],
            out_specs=[
                pl.BlockSpec((tile_m, C), lambda i, k: (i, 0)),
                pl.BlockSpec((1, 1, C), lambda i, k: (i, 0, 0)),
                pl.BlockSpec((1, 1, C), lambda i, k: (i, 0, 0)),
            ],
            scratch_shapes=[pltpu.VMEM((tile_m, C), jnp.float32)],
        ),
        compiler_params=pltpu.CompilerParams(
            dimension_semantics=("parallel", "arbitrary"),
            vmem_limit_bytes=vmem_limit,
        ),
    )(adj_mm, xw_mm, x0w)

    return hidden, psum, psq


# ---------------------------------------------------------------------------
# Kernel 2: BatchNorm (pre-folded per-channel scale/shift) + ReLU
# ---------------------------------------------------------------------------
def _bn_relu_kernel(h_ref, scale_ref, shift_ref, o_ref):
    y = h_ref[...].astype(jnp.float32) * scale_ref[...] + shift_ref[...]
    o_ref[...] = jnp.maximum(y, 0.0).astype(o_ref.dtype)


def bn_relu(hidden, scale, shift, *, tile_m=1024):
    N, C = hidden.shape
    tile_m = _pick_row_tile(N, tile_m)
    return pl.pallas_call(
        _bn_relu_kernel,
        out_shape=jax.ShapeDtypeStruct((N, C), hidden.dtype),
        grid_spec=pltpu.PrefetchScalarGridSpec(
            num_scalar_prefetch=0,
            grid=(N // tile_m,),
            in_specs=[
                pl.BlockSpec((tile_m, C), lambda i: (i, 0)),
                pl.BlockSpec((1, C), lambda i: (0, 0)),
                pl.BlockSpec((1, C), lambda i: (0, 0)),
            ],
            out_specs=pl.BlockSpec((tile_m, C), lambda i: (i, 0)),
        ),
        compiler_params=pltpu.CompilerParams(
            dimension_semantics=("parallel",)),
    )(hidden, scale, shift)


# ---------------------------------------------------------------------------
# DeepGCNLayer forward
# ---------------------------------------------------------------------------
def deep_gcn_layer(x, x_0, adj, weight1, *, alpha, beta,
                   bn_gamma=None, bn_beta=None, eps=1e-5,
                   tile_m=1024, tile_k=2048, use_bf16=True):
    N, C = x.shape
    assert adj.shape == (N, N) and x_0.shape == (N, C) and weight1.shape == (C, C)
    if bn_gamma is None:
        bn_gamma = jnp.ones((C,), jnp.float32)
    if bn_beta is None:
        bn_beta = jnp.zeros((C,), jnp.float32)

    # Fold the beta identity-mapping into the weight and hoist the tiny
    # [*, C] @ [C, C] matmuls to XLA (keeps the big accumulation path f32):
    #   ((1-a)*adj@x + a*x_0) @ W'  ==  (1-a)*adj@(x@W') + a*(x_0@W')
    hp = jax.lax.Precision.HIGHEST
    w_fold = (1.0 - beta) * jnp.eye(C, dtype=jnp.float32) \
        + beta * weight1.astype(jnp.float32)
    xw = jnp.dot(x.astype(jnp.float32), w_fold, precision=hp)
    x0w = jnp.dot(x_0.astype(jnp.float32), w_fold, precision=hp)

    hidden, psum, psq = gcn_aggregate(adj, xw, x0w, alpha=alpha,
                                      out_dtype=x.dtype,
                                      tile_m=tile_m, tile_k=tile_k,
                                      use_bf16=use_bf16)

    # BatchNorm (training-mode batch statistics over the node dimension),
    # folded from the per-row-tile partial sums emitted by the kernel epilogue.
    total = jnp.sum(psum, axis=(0, 1))
    total_sq = jnp.sum(psq, axis=(0, 1))
    mean = total / N
    var = jnp.maximum(total_sq / N - mean * mean, 0.0)   # biased var (training BN)
    scale = bn_gamma.astype(jnp.float32) * jax.lax.rsqrt(var + eps)
    shift = bn_beta.astype(jnp.float32) - mean * scale

    out = bn_relu(hidden, scale.reshape(1, C), shift.reshape(1, C), tile_m=tile_m)
    # TODO(synk): training-mode dropout (p=0.5, stochastic) not implemented;
    # eval-mode dropout is the identity, which is what is returned here.
    # TODO(synk): shared_weights=False (separate weight2) not needed: DeepGCNLayer
    # constructs GCNLayer with the default shared_weights=True.
    return out


# ---------------------------------------------------------------------------
# Reference and helpers
# ---------------------------------------------------------------------------
def glorot(key, shape):
    """Deterministic glorot/xavier-uniform init (matches torch_geometric glorot)."""
    fan_in, fan_out = shape[-2], shape[-1]
    limit = jnp.sqrt(6.0 / (fan_in + fan_out))
    return jax.random.uniform(key, shape, jnp.float32, -limit, limit)


def deep_gcn_layer_ref(x, x_0, adj, weight1, *, alpha, beta,
                       bn_gamma, bn_beta, eps=1e-5):
    """Pure-JAX reference mirroring the PyTorch DeepGCNLayer forward (eval dropout)."""
    hp = jax.lax.Precision.HIGHEST
    h = jnp.dot(adj, x, precision=hp)
    out = (1.0 - alpha) * h + alpha * x_0
    out = (1.0 - beta) * out + beta * jnp.dot(out, weight1, precision=hp)
    mean = jnp.mean(out, axis=0)
    var = jnp.var(out, axis=0)                         # biased, as training BN
    y = (out - mean) * jax.lax.rsqrt(var + eps) * bn_gamma + bn_beta
    return jnp.maximum(y, 0.0)


if __name__ == "__main__":
    # Module hyper-params (DeepGCNLayer defaults, with a concrete layer index).
    channels = 128
    alpha = 0.5
    lamda, layer = 0.5, 2
    beta = log(lamda / layer + 1.0)          # as in GCNLayer.__init__

    # Small, deterministic inputs.
    N = 256  # number of nodes
    key = jax.random.PRNGKey(0)
    k_x, k_x0, k_adj, k_w, k_g, k_b = jax.random.split(key, 6)

    x = jax.random.normal(k_x, (N, channels), jnp.float32)
    x_0 = jax.random.normal(k_x0, (N, channels), jnp.float32)
    a = jax.random.uniform(k_adj, (N, N), jnp.float32)
    adj = (a + a.T) / (2.0 * N)              # symmetric, normalized-ish adjacency
    weight1 = glorot(k_w, (channels, channels))
    bn_gamma = jax.random.uniform(k_g, (channels,), jnp.float32, 0.5, 1.5)
    bn_beta = 0.1 * jax.random.normal(k_b, (channels,), jnp.float32)

    ref = deep_gcn_layer_ref(x, x_0, adj, weight1, alpha=alpha, beta=beta,
                             bn_gamma=bn_gamma, bn_beta=bn_beta)

    # Default path: bf16 MXU operands (adj, x@W'), f32 accumulation + epilogue.
    out_bf16 = deep_gcn_layer(x, x_0, adj, weight1, alpha=alpha, beta=beta,
                              bn_gamma=bn_gamma, bn_beta=bn_beta)
    out_bf16 = jax.block_until_ready(out_bf16)
    assert out_bf16.shape == (N, channels)
    assert jnp.allclose(out_bf16, ref, atol=2e-2, rtol=2e-2), \
        "bf16 path mismatch vs reference"

    # Full-f32 matmul path (tight tolerance).
    out_f32 = deep_gcn_layer(x, x_0, adj, weight1, alpha=alpha, beta=beta,
                             bn_gamma=bn_gamma, bn_beta=bn_beta, use_bf16=False)
    out_f32 = jax.block_until_ready(out_f32)
    assert jnp.allclose(out_f32, ref, atol=2e-3, rtol=2e-3), \
        "f32 path mismatch vs reference"

    print("KERNEL_OK")
</pallas_src>

<mosaic_0001>
module attributes {stable_mosaic.version = 11 : i64} {
  func.func @gcn_kernel(%arg0: i32, %arg1: i32, %arg2: memref<128x256xbf16, #tpu.memory_space<vmem>>, %arg3: memref<256x128xbf16, #tpu.memory_space<vmem>>, %arg4: memref<128x128xf32, #tpu.memory_space<vmem>>, %arg5: memref<128x128xf32, #tpu.memory_space<vmem>>, %arg6: memref<1x1x128xf32, #tpu.memory_space<vmem>>, %arg7: memref<1x1x128xf32, #tpu.memory_space<vmem>>, %arg8: memref<128x128xf32, #tpu.memory_space<vmem>>) attributes {dimension_semantics = [#tpu.dimension_semantics<parallel>, #tpu.dimension_semantics<arbitrary>], iteration_bounds = array<i64: 2, 1>, scalar_prefetch = 0 : i64, scratch_operands = 1 : i64, tpu.core_type = #tpu.core_type<tc>, window_params = [{transform_indices = @transform_0, window_bounds = array<i64: 128, 256>}, {pipeline_mode = #tpu.pipeline_mode<synchronous>, transform_indices = @transform_1, window_bounds = array<i64: 256, 128>}, {transform_indices = @transform_2, window_bounds = array<i64: 128, 128>}, {transform_indices = @transform_3, window_bounds = array<i64: 128, 128>}, {transform_indices = @transform_4, window_bounds = array<i64: 1, 1, 128>}, {transform_indices = @transform_5, window_bounds = array<i64: 1, 1, 128>}]} {
    %c0_i32 = arith.constant 0 : i32
    %0 = arith.cmpi eq, %arg1, %c0_i32 : i32
    %1 = arith.extui %0 : i1 to i32
    %c0_i32_0 = arith.constant 0 : i32
    %2 = arith.cmpi ne, %1, %c0_i32_0 : i32
    scf.if %2 {
      %cst_9 = arith.constant 0.000000e+00 : f32
      %15 = vector.broadcast %cst_9 : f32 to vector<128x128xf32>
      %c0_10 = arith.constant 0 : index
      %c0_11 = arith.constant 0 : index
      %16 = vector.load %arg8[%c0_10, %c0_11] : memref<128x128xf32, #tpu.memory_space<vmem>>, vector<128x128xf32>
      tpu.vector_store %arg8[%c0_10, %c0_11], %15 {strides = array<i32>} : memref<128x128xf32, #tpu.memory_space<vmem>>, vector<128x128xf32>,
    } else {
    }
    %c256_i32 = arith.constant 256 : i32
    %3 = arith.muli %arg1, %c256_i32 : i32
    %4 = tpu.assume_multiple %3, 256 : i32
    %5 = arith.index_cast %4 : i32 to index
    %c0 = arith.constant 0 : index
    %6 = vector.load %arg3[%5, %c0] : memref<256x128xbf16, #tpu.memory_space<vmem>>, vector<256x128xbf16>
    %c0_1 = arith.constant 0 : index
    %c0_2 = arith.constant 0 : index
    %7 = vector.load %arg8[%c0_1, %c0_2] : memref<128x128xf32, #tpu.memory_space<vmem>>, vector<128x128xf32>
    %c0_3 = arith.constant 0 : index
    %c0_4 = arith.constant 0 : index
    %8 = vector.load %arg2[%c0_3, %c0_4] : memref<128x256xbf16, #tpu.memory_space<vmem>>, vector<128x256xbf16>
    %cst = arith.constant dense<0.000000e+00> : vector<128x128xf32>
    %9 = tpu.matmul %8, %6, %cst {dimension_numbers = #tpu.dot_dimension_numbers<[1], [0], [0], [1], [0, 0, 1, 1], [], []>} : vector<128x256xbf16>, vector<256x128xbf16>, vector<128x128xf32> -> vector<128x128xf32>
    %10 = arith.addf %7, %9 : vector<128x128xf32>
    %c0_5 = arith.constant 0 : index
    %c0_6 = arith.constant 0 : index
    %11 = vector.load %arg8[%c0_5, %c0_6] : memref<128x128xf32, #tpu.memory_space<vmem>>, vector<128x128xf32>
    tpu.vector_store %arg8[%c0_5, %c0_6], %10 {strides = array<i32>} : memref<128x128xf32, #tpu.memory_space<vmem>>, vector<128x128xf32>,
    %c0_i32_7 = arith.constant 0 : i32
    %12 = arith.cmpi eq, %arg1, %c0_i32_7 : i32
    %13 = arith.extui %12 : i1 to i32
    %c0_i32_8 = arith.constant 0 : i32
    %14 = arith.cmpi ne, %13, %c0_i32_8 : i32
    scf.if %14 {
      %c0_9 = arith.constant 0 : index
      %c0_10 = arith.constant 0 : index
      %15 = vector.load %arg8[%c0_9, %c0_10] : memref<128x128xf32, #tpu.memory_space<vmem>>, vector<128x128xf32>
      %cst_11 = arith.constant 5.000000e-01 : f32
      %16 = vector.broadcast %cst_11 : f32 to vector<128x128xf32>
      %17 = arith.mulf %16, %15 : vector<128x128xf32>
      %c0_12 = arith.constant 0 : index
      %c0_13 = arith.constant 0 : index
      %18 = vector.load %arg4[%c0_12, %c0_13] : memref<128x128xf32, #tpu.memory_space<vmem>>, vector<128x128xf32>
      %cst_14 = arith.constant 5.000000e-01 : f32
      %19 = vector.broadcast %cst_14 : f32 to vector<128x128xf32>
      %20 = arith.mulf %19, %18 : vector<128x128xf32>
      %21 = arith.addf %17, %20 : vector<128x128xf32>
      %c0_15 = arith.constant 0 : index
      %c0_16 = arith.constant 0 : index
      %22 = vector.load %arg5[%c0_15, %c0_16] : memref<128x128xf32, #tpu.memory_space<vmem>>, vector<128x128xf32>
      tpu.vector_store %arg5[%c0_15, %c0_16], %21 {strides = array<i32>} : memref<128x128xf32, #tpu.memory_space<vmem>>, vector<128x128xf32>,
      %cst_17 = arith.constant dense<0.000000e+00> : vector<128xf32>
      %23 = vector.multi_reduction <add>, %21, %cst_17 [0] : vector<128x128xf32> to vector<128xf32>
      %24 = vector.shape_cast %23 : vector<128xf32> to vector<1x128xf32>
      %25 = arith.mulf %21, %21 : vector<128x128xf32>
      %cst_18 = arith.constant dense<0.000000e+00> : vector<128xf32>
      %26 = vector.multi_reduction <add>, %25, %cst_18 [0] : vector<128x128xf32> to vector<128xf32>
      %27 = vector.shape_cast %26 : vector<128xf32> to vector<1x128xf32>
      %28 = vector.shape_cast %24 : vector<1x128xf32> to vector<1x1x128xf32>
      %c0_19 = arith.constant 0 : index
      %c0_20 = arith.constant 0 : index
      %c0_21 = arith.constant 0 : index
      %29 = vector.load %arg6[%c0_19, %c0_20, %c0_21] : memref<1x1x128xf32, #tpu.memory_space<vmem>>, vector<1x1x128xf32>
      tpu.vector_store %arg6[%c0_19, %c0_20, %c0_21], %28 {strides = array<i32>} : memref<1x1x128xf32, #tpu.memory_space<vmem>>, vector<1x1x128xf32>,
      %30 = vector.shape_cast %27 : vector<1x128xf32> to vector<1x1x128xf32>
      %c0_22 = arith.constant 0 : index
      %c0_23 = arith.constant 0 : index
      %c0_24 = arith.constant 0 : index
      %31 = vector.load %arg7[%c0_22, %c0_23, %c0_24] : memref<1x1x128xf32, #tpu.memory_space<vmem>>, vector<1x1x128xf32>
      tpu.vector_store %arg7[%c0_22, %c0_23, %c0_24], %30 {strides = array<i32>} : memref<1x1x128xf32, #tpu.memory_space<vmem>>, vector<1x1x128xf32>,
    } else {
    }
    return
  }
  func.func @transform_0(%arg0: i32, %arg1: i32) -> (i32, i32) {
    %c0_i32 = arith.constant 0 : i32
    return %arg0, %arg1 : i32, i32
  }
  func.func @transform_1(%arg0: i32, %arg1: i32) -> (i32, i32) {
    %c0_i32 = arith.constant 0 : i32
    %c0_i32_0 = arith.constant 0 : i32
    %c0_i32_1 = arith.constant 0 : i32
    return %c0_i32, %c0_i32_0 : i32, i32
  }
  func.func @transform_2(%arg0: i32, %arg1: i32) -> (i32, i32) {
    %c0_i32 = arith.constant 0 : i32
    %c0_i32_0 = arith.constant 0 : i32
    return %arg0, %c0_i32 : i32, i32
  }
  func.func @transform_3(%arg0: i32, %arg1: i32) -> (i32, i32) {
    %c0_i32 = arith.constant 0 : i32
    %c0_i32_0 = arith.constant 0 : i32
    return %arg0, %c0_i32 : i32, i32
  }
  func.func @transform_4(%arg0: i32, %arg1: i32) -> (i32, i32, i32) {
    %c0_i32 = arith.constant 0 : i32
    %c0_i32_0 = arith.constant 0 : i32
    %c0_i32_1 = arith.constant 0 : i32
    return %arg0, %c0_i32, %c0_i32_0 : i32, i32, i32
  }
  func.func @transform_5(%arg0: i32, %arg1: i32) -> (i32, i32, i32) {
    %c0_i32 = arith.constant 0 : i32
    %c0_i32_0 = arith.constant 0 : i32
    %c0_i32_1 = arith.constant 0 : i32
    return %arg0, %c0_i32, %c0_i32_0 : i32, i32, i32
  }
}

</mosaic_0001>

<bundles_post_ra>
// kernel: tpu_custom_call.1
= control target key start
LH: loop header
LB: loop body
LE: loop exit
PB: predicated region body
PF: predicated region fallthrough
CT: control target
= control target key end

     0   :  { %11 = vsyncpa [#allocation4], 0  ;;  %s2109_s0 = inlined_call_operand.hbm [shape: bf16[256,256], index: 0, kind: input, shape index: {}]   ;;  %s2110_s1 = inlined_call_operand.hbm [shape: bf16[256,128], index: 1, kind: input, shape index: {}]   ;;  %s2111_s2 = inlined_call_operand.hbm [shape: f32[256,128], index: 2, kind: input, shape index: {}]   ;;  %s2112_s3 = inlined_call_operand.hbm [shape: f32[256,128], index: 3, kind: output, shape index: {0}]   ;;  %s2113_s4 = inlined_call_operand.hbm [shape: f32[2,1,128], index: 4, kind: output, shape index: {1}]   ;;  %s2114_s5 = inlined_call_operand.hbm [shape: f32[2,1,128], index: 5, kind: output, shape index: {2}]  }
   0x1   :  { %13 = vsyncpa [#allocation4 + $0x1], 0 }
   0x2   :  { %14 = vsyncpa [#allocation7], 0 }
   0x3   :  { %15 = vsyncpa [#allocation5], 0 }
   0x4   :  { %17 = vsyncpa [#allocation5 + $0x1], 0 }
   0x5   :  { %18 = vsyncpa [#allocation11], 0 }
   0x6   :  { %20 = vsyncpa [#allocation11 + $0x1], 0  ;;  %s1659_s18 = smov 0   ;;  %s1661_s19 = smov 0  }
   0x7   :  { %s1663_s20 = smov 0   ;;  %s1665_s21 = smov 0  }
   0x8   :  { %s1667_s22 = smov 0   ;;  %s1669_s23 = smov 0  }
   0x9 LB: > { %s38_s24 = sadd.s32 1, %s1611_s22  ;;  %s47_s25 = sadd.s32 1, %s1603_s20  ;;  %s1615_s23 = sphi %s1669_s23, %s26_s23   ;;  %s1611_s22 = sphi %s1667_s22, %s2144_s22   ;;  %s1607_s21 = sphi %s1665_s21, %s2143_s21   ;;  %s1603_s20 = sphi %s1663_s20, %s2142_s20   ;;  %s1599_s19 = sphi %s1661_s19, %s2141_s19   ;;  %s1595_s18 = sphi %s1659_s18, %s2140_s18  }
   0xa   : > { %p40_p0 = scmp.ge.s32.totalorder %s38_s24, 2  ;;  %p54_p1 = scmp.ne.s32.totalorder %s1603_s20, %s1599_s19 }
   0xb   : > { %p55_p2 = scmp.eq.s32.totalorder %s1615_s23, 0  ;;  %p1279_p5 = scmp.lt.s32.totalorder %s1615_s23, 2 }
   0xc   : > { %s2146_s24 = smov (%p40_p0, %s38_s24), 0  ;;  %s222_s27 = sand.u32 1, %s1615_s23  }
   0xd   : > { %p56_p4 = por %p55_p2, %p54_p1  ;;  %s42_s26 = ssub.s32 %s1611_s22, %s2146_s24 }
   0xe   : > { %p45_p6 = scmp.eq.s32.totalorder %s42_s26, 0  ;;  %s224_s28 = sand.u32 1, %s1603_s20  }
   0xf   : > { %s1160_s29 = sshll.u32 %s1611_s22, 11  ;;  %s1709_s6 = sshll.u32 %s224_s28, 7 }
  0x10   : > { %s1707_s30 = scalar_select %p45_p6, %s1603_s20, %s47_s25  }
  0x11   : > { %s1716_s9 = scalar_lea.hbm %s2109_s0, %s1160_s29  ;;  %p1718_p7 = pnand %p1279_p5, %p56_p4 }
  0x12   : > { %s226_s11 = scalar_lea.vmem [#allocation3], %s1709_s6  ;;  %s1725_s13 = scalar_lea.sflag [#allocation4], %s222_s27 }
  0x13   : > { %s236_s12 = sshll.u32 %s226_s11, 4  ;;  %s1377_s14 = scalar_lea.hbm %s1716_s9, 2048  ;;  %s1723_s12 = int_to_ptr.vmem [resolvable:$true] %s236_s12 }
  0x14   : > { %p1378_p8 = scmp.ne.s32.totalorder %s1716_s9, %s1377_s14  ;;  %p1379_p9 = pneg %p1718_p7 }
  0x15   : > { %s1382_s17 = scalar_lea.hbm %s2109_s0, 4096  ;;  %p1383_p12 = scmp.lt.u32.totalorder %s1716_s9, %s2109_s0 }
  0x16   : > { %p1380_p10 = pnand %p1379_p9, %p1378_p8  ;;  %p1384_p13 = scmp.lt.u32.totalorder %s1382_s17, %s1377_s14 }
  0x17   : > { %p1386_p2 = scmp.lt.u32.totalorder %s1377_s14, %s1716_s9 }
  0x18   : > { %p1381_p11 = pneg %p1380_p10  ;;  %p1385_p0 = por %p1384_p13, %p1383_p12 }
  0x1a   : > { %p1387_p4 = por %p1386_p2, %p1385_p0 }
  0x1c   : > { %p1388_p5 = pnand %p1387_p4, %p1381_p11 }
  0x1e   : > { %1391 = shalt.err (!%p1388_p5)
}
  0x1f   : > { %s1392_s27 = scalar_lea.vmem %s1723_s12, 2048  ;;  %s1617_s28 = smov [#allocation3]  }
  0x20   : > { %p1393_p6 = scmp.ne.s32.totalorder %s1723_s12, %s1392_s27  ;;  %s1397_s7 = sshll.u32 %s1617_s28, 4  ;;  %s1398_s7 = int_to_ptr.vmem [resolvable:$false] %s1397_s7 }
  0x21   : > { %s1399_s8 = scalar_lea.vmem %s1398_s7, 4096  ;;  %p1400_p3 = scmp.lt.s32.totalorder %s1723_s12, %s1398_s7 }
  0x22   : > { %p1395_p8 = pnand %p1393_p6, %p1379_p9  ;;  %p1401_p12 = scmp.lt.s32.totalorder %s1399_s8, %s1392_s27 }
  0x24   : > { %p1396_p10 = pneg %p1395_p8  ;;  %p1402_p13 = por %p1401_p12, %p1400_p3 }
  0x26   : > { %p1403_p0 = pnand %p1402_p13, %p1396_p10 }
  0x28   : > { %1406 = shalt.err (!%p1403_p0)
}
  0x29   : > { %s2116_s11 = smov 128   ;;  %s2117_s14 = smov 8  }
  0x2a   : > { %1264 = dma.hbm_to_vmem [thread:$0]  (!%p1718_p7), %s1716_s9, 2048, %s1723_s12, %s1725_s13, %s2116_s11, %s2116_s11, %s2117_s14  }
  0x2b   : > { %s1761_s17 = scalar_lea.hbm %s2111_s2, %s1160_s29  ;;  %s250_s25 = scalar_lea.vmem [#allocation8], %s1709_s6 }
  0x2c   : > { %s257_s26 = sshll.u32 %s250_s25, 4  ;;  %s1767_s27 = sadd.s32 4294967295, %s1615_s23   ;;  %s1764_s26 = int_to_ptr.vmem [resolvable:$true] %s257_s26 }
  0x2d   : > { %s2115_s28 = sadd.s32 4294967294, %s1615_s23   ;;  %p60_p3 = scmp.ne.s32.totalorder %s1599_s19, %s1595_s18 }
  0x2e   : > { %p2118_p11 = scmp.eq.s32.totalorder %s1767_s27, 0  ;;  %p131_p2 = scmp.eq.s32.totalorder %s1767_s27, 1 }
  0x2f   : > { %p137_p4 = scmp.eq.s32.totalorder %s2115_s28, 1  ;;  %p1105_p5 = scmp.ge.s32.totalorder %s1615_s23, 1 }
  0x30   : > { %p1779_p6 = por %p2118_p11, %p60_p3  ;;  %p1786_p8 = por %p131_p2, %p54_p1 }
  0x31   : > { %p1790_p10 = por %p137_p4, %p60_p3  ;;  %p196_p12 = scmp.lt.s32.totalorder %s1615_s23, 3 }
  0x32   : > { %s2123_s29 = scalar_select %p1779_p6, 1, 0 }
  0x33   : > { %s2124_s6 = scalar_select %p1786_p8, 1, 0 }
  0x34   : > { %s2125_s9 = scalar_select %p1790_p10, 1, 0 }
  0x35   : > { %p1795_p13 = pnand %p1105_p5, %p196_p12  ;;  %s1620_s7 = smov [#allocation6]  }
  0x36   : > { %s208_s8 = sshll.u32 %s1620_s7, 4  ;;  %s1407_s15 = scalar_lea.hbm %s1761_s17, 2048  ;;  %s1799_s8 = int_to_ptr.vmem [resolvable:$true] %s208_s8 }
  0x37   : > { %s2126_s12 = scalar_select %p1795_p13, 1, 0 }
  0x38   : > { %p1408_p0 = scmp.ne.s32.totalorder %s1761_s17, %s1407_s15  ;;  %s1412_s28 = scalar_lea.hbm %s2111_s2, 4096 }
  0x39   : > { %p1413_p4 = scmp.lt.u32.totalorder %s1761_s17, %s2111_s2  ;;  %p1414_p5 = scmp.lt.u32.totalorder %s1412_s28, %s1407_s15 }
  0x3a   : > { %p1410_p3 = pnand %p1408_p0, %p1379_p9  ;;  %p1416_p11 = scmp.lt.u32.totalorder %s1407_s15, %s1761_s17 }
  0x3b   : > { %p1415_p12 = por %p1414_p5, %p1413_p4 }
  0x3c   : > { %p1411_p2 = pneg %p1410_p3 }
  0x3d   : > { %p1417_p10 = por %p1416_p11, %p1415_p12 }
  0x3f   : > { %p1418_p8 = pnand %p1417_p10, %p1411_p2 }
  0x41   : > { %1421 = shalt.err (!%p1418_p8)
}
  0x42   : > { %s1422_s7 = scalar_lea.vmem %s1764_s26, 2048  ;;  %s1621_s16 = smov [#allocation8]  }
  0x43   : > { %p1423_p0 = scmp.ne.s32.totalorder %s1764_s26, %s1422_s7  ;;  %s1427_s25 = sshll.u32 %s1621_s16, 4  ;;  %s1428_s25 = int_to_ptr.vmem [resolvable:$false] %s1427_s25 }
  0x44   : > { %s1429_s11 = scalar_lea.vmem %s1428_s25, 4096  ;;  %p1430_p6 = scmp.lt.s32.totalorder %s1764_s26, %s1428_s25 }
  0x45   : > { %p1425_p3 = pnand %p1423_p0, %p1379_p9  ;;  %p1431_p4 = scmp.lt.s32.totalorder %s1429_s11, %s1422_s7 }
  0x47   : > { %p1426_p1 = pneg %p1425_p3  ;;  %p1432_p5 = por %p1431_p4, %p1430_p6 }
  0x49   : > { %p1433_p11 = pnand %p1432_p5, %p1426_p1 }
  0x4b   : > { %1436 = shalt.err (!%p1433_p11)
}
  0x4c   : > { %s2127_s14 = smov 8   ;;  %s2128_s28 = smov 128  }
  0x4d   : > { %1267 = dma.hbm_to_vmem [thread:$0]  (!%p1718_p7), %s1761_s17, 2048, %s1764_s26, %s1725_s13, %s2128_s28, %s2128_s28, %s2127_s14  }
  0x4e   : > { %p2129_p9 = scmp.eq.s32.totalorder %s1767_s27, 0  ;;  %p2130_p8 = pneg %p1795_p13 }
  0x4f   : > { %s1437_s10 = scalar_lea.hbm %s2110_s1, 2048 }
  0x50   : > { %p1835_p10 = pnand %p2130_p8, %p2129_p9  ;;  %p1438_p6 = scmp.ne.s32.totalorder %s2110_s1, %s1437_s10 }
  0x51   : > { %p1444_p12 = scmp.lt.u32.totalorder %s1437_s10, %s2110_s1 }
  0x52   : > { %p1439_p1 = pneg %p1835_p10 }
  0x54   : > { %p1440_p2 = pnand %p1439_p1, %p1438_p6 }
  0x56   : > { %p1441_p7 = pneg %p1440_p2 }
  0x58   : > { %p1446_p0 = pnand %p1444_p12, %p1441_p7 }
  0x5a   : > { %1449 = shalt.err (!%p1446_p0)
}
  0x5b   : > { %s1450_s26 = scalar_lea.vmem %s1799_s8, 2048  ;;  %p1458_p11 = scmp.lt.s32.totalorder %s1799_s8, %s1799_s8 }
  0x5c   : > { %p1451_p3 = scmp.ne.s32.totalorder %s1799_s8, %s1450_s26  ;;  %p1459_p9 = scmp.lt.s32.totalorder %s1450_s26, %s1450_s26 }
  0x5e   : > { %p1453_p4 = pnand %p1451_p3, %p1439_p1  ;;  %p1460_p8 = por %p1459_p9, %p1458_p11 }
  0x60   : > { %p1454_p5 = pneg %p1453_p4 }
  0x62   : > { %p1461_p13 = pnand %p1460_p8, %p1454_p5 }
  0x64   : > { %1464 = shalt.err (!%p1461_p13)
}
  0x65   : > { %s1622_s14 = smov 64   ;;  %s1623_s28 = smov 4  }
  0x66   : > { %1260 = dma.hbm_to_vmem [thread:$0]  (!%p1835_p10), %s2110_s1, 2048, %s1799_s8, [#allocation7], %s1622_s14, %s1622_s14, %s1623_s28  }
  0x67   : > { %p2132_p6 = scmp.ne.s32.totalorder %s2126_s12, 0 }
  0x68   : > { %s271_s10 = sand.u32 (!%p2132_p6), 1, %s1767_s27   ;;  %s1864_s25 = sand.u32 (!%p2132_p6), 1, %s1599_s19  }
  0x69   : > { %269 = sbr.rel (%p2132_p6) target bundleno = 480 (0x1e0), region = 32  ;;  %s1867_s11 = sshll.u32 (!%p2132_p6), %s1864_s25, 7 }
  0x6a   : > { %s272_s15 = scalar_lea.sflag (!%p2132_p6), [#allocation4], %s271_s10  ;;  %s1872_s13 = scalar_lea.vmem (!%p2132_p6), [#allocation3], %s1867_s11 }
  0x6b   : > { %p2133_p13 = scmp.ne.s32.totalorder (!%p2132_p6), %s2123_s29, 0 }
  0x70   : > { %1574 = dma.done.wait (%p2133_p13), %s272_s15, 2048  }
  0x71   : > { %1576 = vsyncadd (%p2133_p13), %s272_s15, 4294965248  ;;  %p2134_p10 = scmp.eq.s32.totalorder %s1767_s27, 0 }
  0x73   : > { %1578 = dma.done.wait (%p2134_p10), [#allocation7], 2048   ;;  %p2135_p1 = pmov %p2134_p10 }
  0x74   : > { %s1883_s12 = scalar_lea.vmem [#allocation8], %s1867_s11 }
  0x75   : > { %1580 = vsyncadd (%p2135_p1), [#allocation7], 4294965248 }
  0x76   : > { %1582 = dma.done.wait (%p2133_p13), %s272_s15, 2048  }
  0x77   : > { %1584 = vsyncadd (%p2133_p13), %s272_s15, 4294965248  ;;  %v1337_v0 = vld [vmem:[#allocation6 + $0x40] sm:$0xff]   ;;  %v1339_v2 = vld [vmem:[#allocation6 + $0x48] sm:$0xff]   ;;  %s1913_s29 = scalar_lea.vmem [#allocation9], %s1867_s11  ;;  %s1162_s8 = sshll.u32 %s1607_s21, 11 }
  0x78   : > { %v1338_v1 = vld [vmem:[#allocation6] sm:$0xff]   ;;  %1163 = vmatprep.subr.bf16.mxu0 %v1337_v0  ;;  %1227 = vmatprep.subr.bf16.mxu1 %v1337_v0  ;;  %v1340_v3 = vld [vmem:[#allocation6 + $0x8] sm:$0xff]   ;;  %v1341_v4 = vld [vmem:[#allocation6 + $0x50] sm:$0xff]   ;;  %s908_s17 = sshll.u32 %s1913_s29, 4  ;;  %s1961_s28 = scalar_lea.hbm %s2112_s3, %s1162_s8  ;;  %s1963_s17 = int_to_ptr.vmem [resolvable:$true] %s908_s17 }
  0x79   : > { %1164 = vmatpush3.bf16.msra.mxu0 %v1338_v1  ;;  %1235 = vmatpush3.bf16.msra.mxu1 %v1338_v1  ;;  %v1342_v5 = vld [vmem:[#allocation6 + $0x10] sm:$0xff]   ;;  %v1343_v6 = vld [vmem:[#allocation6 + $0x58] sm:$0xff]   ;;  %v1345_v8 = vld [vmem:[#allocation6 + $0x60] sm:$0xff]   ;;  %s887_s7 = scalar_lea.sflag [#allocation5], %s1864_s25  ;;  %s1465_s16 = scalar_lea.vmem %s1963_s17, 2048 }
  0x7a   : > { %1165 = vmatprep.subr.bf16.mxu0 %v1339_v2  ;;  %1228 = vmatprep.subr.bf16.mxu1 %v1339_v2  ;;  %v1344_v7 = vld [vmem:[#allocation6 + $0x18] sm:$0xff]   ;;  %v1346_v9 = vld [vmem:[#allocation6 + $0x20] sm:$0xff]   ;;  %v1347_v10 = vld [vmem:[#allocation6 + $0x68] sm:$0xff]   ;;  %p1466_p2 = scmp.ne.s32.totalorder %s1963_s17, %s1465_s16  ;;  %p2136_p7 = scmp.ne.s32.totalorder %s2124_s6, 0 }
  0x7b   : > { %v1355_v11 = vld [vmem:[%s1872_s13 + $0x4] ss:$8 sps:$4 sm:$0xff]   ;;  %v1349_v14 = vld [vmem:[#allocation6 + $0x70] sm:$0xff]   ;;  %v1351_v16 = vld [vmem:[#allocation6 + $0x78] sm:$0xff]   ;;  %s1624_s11 = smov [#allocation9]  }
  0x7c   : > { %v1348_v12 = vld [vmem:[#allocation6 + $0x28] sm:$0xff]   ;;  %630 = vmatprep.mubr.bf16.mxu0 %v1355_v11  ;;  %v1350_v15 = vld [vmem:[#allocation6 + $0x30] sm:$0xff]   ;;  %v1352_v17 = vld [vmem:[#allocation6 + $0x38] sm:$0xff]   ;;  %p1467_p12 = pnand %p1466_p2, %p2136_p7  ;;  %s1469_s15 = sshll.u32 %s1624_s11, 4  ;;  %s1470_s15 = int_to_ptr.vmem [resolvable:$false] %s1469_s15 }
  0x7d   : > { %1166 = vmatpush3.bf16.msra.mxu0 %v1340_v3  ;;  %1236 = vmatpush3.bf16.msra.mxu1 %v1340_v3  ;;  %v1361_v13 = vld [vmem:[%s1872_s13 + $0x44] ss:$8 sps:$4 sm:$0xff]   ;;  %v1353_v18 = vld [vmem:[%s1872_s13] ss:$8 sps:$4 sm:$0xff]   ;;  %v1356_v20 = vld [vmem:[%s1872_s13 + $0x14] ss:$8 sps:$4 sm:$0xff]   ;;  %p1472_p3 = scmp.lt.s32.totalorder %s1963_s17, %s1470_s15 }
  0x7e   : > { %1167 = vmatprep.subr.bf16.mxu0 %v1341_v4  ;;  %1229 = vmatprep.subr.bf16.mxu1 %v1341_v4  ;;  %v1359_v19 = vld [vmem:[%s1872_s13 + $0x40] ss:$8 sps:$4 sm:$0xff]   ;;  %v1365_v21 = vld [vmem:[%s1872_s13 + $0x54] ss:$8 sps:$4 sm:$0xff]   ;;  %v1358_v22 = vld [vmem:[%s1872_s13 + $0x10] ss:$8 sps:$4 sm:$0xff]   ;;  %p1468_p0 = pneg %p1467_p12 }
  0x7f   : > { %662 = vmatprep.mubr.bf16.mxu1 %v1361_v13  ;;  %v1367_v23 = vld [vmem:[%s1872_s13 + $0x50] ss:$8 sps:$4 sm:$0xff]   ;;  %v1362_v24 = vld [vmem:[%s1872_s13 + $0x24] ss:$8 sps:$4 sm:$0xff]   ;;  %v1364_v26 = vld [vmem:[%s1872_s13 + $0x20] ss:$8 sps:$4 sm:$0xff]  }
  0x80   : > { %v1371_v25 = vld [vmem:[%s1872_s13 + $0x64] ss:$8 sps:$4 sm:$0xff]   ;;  %v1373_v27 = vld [vmem:[%s1872_s13 + $0x60] ss:$8 sps:$4 sm:$0xff]   ;;  %v1368_v28 = vld [vmem:[%s1872_s13 + $0x34] ss:$8 sps:$4 sm:$0xff]  }
  0x81   : > { %1168 = vmatpush3.bf16.msra.mxu0 %v1342_v5  ;;  %1237 = vmatpush3.bf16.msra.mxu1 %v1342_v5  ;;  %v1374_v29 = vld [vmem:[%s1872_s13 + $0x74] ss:$8 sps:$4 sm:$0xff]   ;;  %v1370_v30 = vld [vmem:[%s1872_s13 + $0x30] ss:$8 sps:$4 sm:$0xff]   ;;  %v762_v32 = vld [vmem:[%s1883_s12] sm:$0xff] }
  0x82   : > { %1169 = vmatprep.subr.bf16.mxu0 %v1343_v6  ;;  %1230 = vmatprep.subr.bf16.mxu1 %v1343_v6  ;;  %v1376_v31 = vld [vmem:[%s1872_s13 + $0x70] ss:$8 sps:$4 sm:$0xff]   ;;  %v770_v33 = vld [vmem:[%s1883_s12 + $0x40] sm:$0xff]  ;;  %v763_v35 = vld [vmem:[%s1883_s12 + $0x8] sm:$0xff]  ;;  %v778_v41 = vmul.f32 0.5, %v762_v32  ;;  %s1471_s13 = scalar_lea.vmem %s1470_s15, 4096 }
  0x83   : > { %v771_v37 = vld [vmem:[%s1883_s12 + $0x48] sm:$0xff]  ;;  %v786_v44 = vmul.f32 0.5, %v770_v33  ;;  %v779_v47 = vmul.f32 0.5, %v763_v35  ;;  %v764_v56 = vld [vmem:[%s1883_s12 + $0x10] sm:$0xff]  ;;  %v765_v61 = vld [vmem:[%s1883_s12 + $0x18] sm:$0xff]  ;;  %p1473_p4 = scmp.lt.s32.totalorder %s1471_s13, %s1465_s16 }
  0x84   : > { %v787_v49 = vmul.f32 0.5, %v771_v37  ;;  %v772_v0 = vld [vmem:[%s1883_s12 + $0x50] sm:$0xff]  ;;  %v773_v1 = vld [vmem:[%s1883_s12 + $0x58] sm:$0xff]  ;;  %v780_v3 = vmul.f32 0.5, %v764_v56  ;;  %v775_v35 = vld [vmem:[%s1883_s12 + $0x68] sm:$0xff] }
  0x85   : > { %1170 = vmatpush3.bf16.msra.mxu0 %v1344_v7  ;;  %1238 = vmatpush3.bf16.msra.mxu1 %v1344_v7  ;;  %p1474_p5 = por %p1473_p4, %p1472_p3 }
  0x86   : > { %1171 = vmatprep.subr.bf16.mxu0 %v1345_v8  ;;  %1231 = vmatprep.subr.bf16.mxu1 %v1345_v8 }
  0x87   : > { %p1475_p11 = pnand %p1474_p5, %p1468_p0 }
  0x89   : > { %1172 = vmatpush3.bf16.msra.mxu0 %v1346_v9  ;;  %1239 = vmatpush3.bf16.msra.mxu1 %v1346_v9 }
  0x8a   : > { %1173 = vmatprep.subr.bf16.mxu0 %v1347_v10  ;;  %1232 = vmatprep.subr.bf16.mxu1 %v1347_v10 }
  0x8d   : > { %1174 = vmatpush3.bf16.msra.mxu0 %v1348_v12  ;;  %1240 = vmatpush3.bf16.msra.mxu1 %v1348_v12  ;;  %v781_v12 = vmul.f32 0.5, %v765_v61 }
  0x8e   : > { %1175 = vmatprep.subr.bf16.mxu0 %v1349_v14  ;;  %1233 = vmatprep.subr.bf16.mxu1 %v1349_v14  ;;  %v788_v14 = vmul.f32 0.5, %v772_v0 }
  0x91   : > { %1176 = vmatpush3.bf16.msra.mxu0 %v1350_v15  ;;  %1241 = vmatpush3.bf16.msra.mxu1 %v1350_v15 }
  0x92   : > { %1177 = vmatprep.subr.bf16.mxu0 %v1351_v16  ;;  %1234 = vmatprep.subr.bf16.mxu1 %v1351_v16  ;;  %v789_v16 = vmul.f32 0.5, %v773_v1 }
  0x95   : > { %1178 = vmatpush3.bf16.msra.mxu0 %v1352_v17  ;;  %1242 = vmatpush3.bf16.msra.mxu1 %v1352_v17 }
  0x98   : > { %631 = vmatmul.mubr.bf16.vlgmr.msra.gmra.mrb[0].mxu0 %v1353_v18  ;;  %663 = vmatmul.mubr.bf16.vlgmr.msra.gmra.mrb[0].mxu1 %v1359_v19 }
  0x99   : > { %638 = vmatprep.mubr.bf16.mxu0 %v1356_v20  ;;  %670 = vmatprep.mubr.bf16.mxu1 %v1365_v21 }
  0xa0   : > { %639 = vmatmul.mubr.bf16.gmra.mrb[4].mxu0 %v1358_v22  ;;  %671 = vmatmul.mubr.bf16.gmra.mrb[4].mxu1 %v1367_v23 }
  0xa1   : > { %646 = vmatprep.mubr.bf16.mxu0 %v1362_v24  ;;  %678 = vmatprep.mubr.bf16.mxu1 %v1371_v25  ;;  %v766_v24 = vld [vmem:[%s1883_s12 + $0x20] sm:$0xff] }
  0xa2   : > { %v782_v37 = vmul.f32 0.5, %v766_v24 }
  0xa8   : > { %647 = vmatmul.mubr.bf16.gmra.mrb[8].mxu0 %v1364_v26  ;;  %679 = vmatmul.mubr.bf16.gmra.mrb[8].mxu1 %v1373_v27 }
  0xa9   : > { %654 = vmatprep.mubr.bf16.mxu0 %v1368_v28  ;;  %686 = vmatprep.mubr.bf16.mxu1 %v1374_v29 }
  0xb0   : > { %655 = vmatmul.mubr.bf16.gmra.mrb[12].mxu0 %v1370_v30  ;;  %687 = vmatmul.mubr.bf16.gmra.mrb[12].mxu1 %v1376_v31  ;;  %v767_v31 = vld [vmem:[%s1883_s12 + $0x28] sm:$0xff] }
 0x16b   : > { %v1179_v34 = vpop.f32.mrb[0].mxu0  ;;  %v1203_v36 = vpop.f32.mrb[0].mxu1 }
 0x16c   : > { %v1180_v38 = vpop.f32.mrb[1].mxu0  ;;  %v1204_v39 = vpop.f32.mrb[1].mxu1 }
 0x16d   : > { %v1181_v40 = vadd.f32 %v1180_v38, %v1179_v34  ;;  %v1182_v42 = vpop.f32.mrb[2].mxu0  ;;  %v1205_v43 = vadd.f32 %v1204_v39, %v1203_v36  ;;  %v1206_v45 = vpop.f32.mrb[2].mxu1  ;;  %v774_v34 = vld [vmem:[%s1883_s12 + $0x60] sm:$0xff] }
 0x16e   : > { %v1183_v46 = vpop.f32.mrb[3].mxu0  ;;  %v1207_v48 = vpop.f32.mrb[3].mxu1 }
 0x16f   : > { %v746_v50 = vmul.f32 0.5, %v1181_v40  ;;  %v1184_v51 = vadd.f32 %v1183_v46, %v1182_v42  ;;  %v754_v52 = vmul.f32 0.5, %v1205_v43  ;;  %v1208_v53 = vadd.f32 %v1207_v48, %v1206_v45 }
 0x170   : > { %v783_v46 = vmul.f32 0.5, %v767_v31  ;;  %v790_v48 = vmul.f32 0.5, %v774_v34 }
 0x171   : > { %v794_v54 = vadd.f32 %v778_v41, %v746_v50  ;;  %v747_v55 = vmul.f32 0.5, %v1184_v51  ;;  %v1910_v57 = vadd.f32 %v786_v44, %v754_v52  ;;  %v755_v58 = vmul.f32 0.5, %v1208_v53 }
 0x172   : > { %v791_v50 = vmul.f32 0.5, %v775_v35 }
 0x173   : > { %810 = vst [vmem:[%s1913_s29] sm:$0xff] %v794_v54  ;;  %v795_v59 = vadd.f32 %v779_v47, %v747_v55  ;;  %v1185_v60 = vpop.f32.mrb[4].mxu0  ;;  %818 = vst [vmem:[%s1913_s29 + $0x40] sm:$0xff] %v1910_v57  ;;  %v1919_v62 = vadd.f32 %v787_v49, %v755_v58  ;;  %v1209_v63 = vpop.f32.mrb[4].mxu1  ;;  %v847_v5 = vmul.f32 %v794_v54, %v794_v54 }
 0x174   : > { %v1186_v2 = vpop.f32.mrb[5].mxu0  ;;  %v1210_v4 = vpop.f32.mrb[5].mxu1 }
 0x175   : > { %811 = vst [vmem:[%s1913_s29 + $0x8] sm:$0xff] %v795_v59  ;;  %v826_v6 = vadd.f32 %v795_v59, %v794_v54  ;;  %v848_v7 = vmul.f32 %v795_v59, %v795_v59  ;;  %v1187_v8 = vadd.f32 %v1186_v2, %v1185_v60  ;;  %v1188_v9 = vpop.f32.mrb[6].mxu0  ;;  %819 = vst [vmem:[%s1913_s29 + $0x48] sm:$0xff] %v1919_v62  ;;  %v1212_v10 = vpop.f32.mrb[6].mxu1  ;;  %v768_v59 = vld [vmem:[%s1883_s12 + $0x30] sm:$0xff] }
 0x176   : > { %v1189_v11 = vpop.f32.mrb[7].mxu0  ;;  %v1211_v13 = vadd.f32 %v1210_v4, %v1209_v63  ;;  %v1213_v15 = vpop.f32.mrb[7].mxu1 }
 0x177   : > { %v863_v17 = vadd.f32 %v848_v7, %v847_v5  ;;  %v748_v18 = vmul.f32 0.5, %v1187_v8  ;;  %v1190_v19 = vadd.f32 %v1189_v11, %v1188_v9  ;;  %v1214_v20 = vadd.f32 %v1213_v15, %v1212_v10  ;;  %v777_v7 = vld [vmem:[%s1883_s12 + $0x78] sm:$0xff] }
 0x178   : > { %v756_v21 = vmul.f32 0.5, %v1211_v13  ;;  %v784_v9 = vmul.f32 0.5, %v768_v59 }
 0x179   : > { %v796_v22 = vadd.f32 %v780_v3, %v748_v18  ;;  %v749_v23 = vmul.f32 0.5, %v1190_v19  ;;  %v757_v25 = vmul.f32 0.5, %v1214_v20  ;;  %v769_v3 = vld [vmem:[%s1883_s12 + $0x38] sm:$0xff] }
 0x17a   : > { %v1927_v26 = vadd.f32 %v788_v14, %v756_v21  ;;  %v785_v18 = vmul.f32 0.5, %v769_v3 }
 0x17b   : > { %812 = vst [vmem:[%s1913_s29 + $0x10] sm:$0xff] %v796_v22  ;;  %v827_v27 = vadd.f32 %v826_v6, %v796_v22  ;;  %v849_v28 = vmul.f32 %v796_v22, %v796_v22  ;;  %v797_v29 = vadd.f32 %v781_v12, %v749_v23  ;;  %v1191_v30 = vpop.f32.mrb[8].mxu0  ;;  %v1931_v32 = vadd.f32 %v789_v16, %v757_v25  ;;  %v1215_v33 = vpop.f32.mrb[8].mxu1  ;;  %v776_v6 = vld [vmem:[%s1883_s12 + $0x70] sm:$0xff] }
 0x17c   : > { %v1192_v36 = vpop.f32.mrb[9].mxu0  ;;  %820 = vst [vmem:[%s1913_s29 + $0x50] sm:$0xff] %v1927_v26  ;;  %v1216_v38 = vpop.f32.mrb[9].mxu1  ;;  %v792_v20 = vmul.f32 0.5, %v776_v6  ;;  %v793_v22 = vmul.f32 0.5, %v777_v7 }
 0x17d   : > { %v864_v39 = vadd.f32 %v863_v17, %v849_v28  ;;  %813 = vst [vmem:[%s1913_s29 + $0x18] sm:$0xff] %v797_v29  ;;  %v828_v40 = vadd.f32 %v827_v27, %v797_v29  ;;  %v850_v41 = vmul.f32 %v797_v29, %v797_v29  ;;  %v1193_v42 = vadd.f32 %v1192_v36, %v1191_v30  ;;  %v1194_v43 = vpop.f32.mrb[10].mxu0  ;;  %v1218_v44 = vpop.f32.mrb[10].mxu1 }
 0x17e   : > { %821 = vst [vmem:[%s1913_s29 + $0x58] sm:$0xff] %v1931_v32  ;;  %v1195_v45 = vpop.f32.mrb[11].mxu0  ;;  %v1217_v47 = vadd.f32 %v1216_v38, %v1215_v33  ;;  %v1219_v49 = vpop.f32.mrb[11].mxu1 }
 0x17f   : > { %v865_v51 = vadd.f32 %v864_v39, %v850_v41  ;;  %v750_v52 = vmul.f32 0.5, %v1193_v42  ;;  %v1196_v53 = vadd.f32 %v1195_v45, %v1194_v43  ;;  %v1220_v54 = vadd.f32 %v1219_v49, %v1218_v44 }
 0x180   : > { %v758_v55 = vmul.f32 0.5, %v1217_v47 }
 0x181   : > { %v798_v56 = vadd.f32 %v782_v37, %v750_v52  ;;  %v751_v58 = vmul.f32 0.5, %v1196_v53  ;;  %v759_v60 = vmul.f32 0.5, %v1220_v54 }
 0x182   : > { %v1941_v61 = vadd.f32 %v790_v48, %v758_v55 }
 0x183   : > { %814 = vst [vmem:[%s1913_s29 + $0x20] sm:$0xff] %v798_v56  ;;  %v829_v63 = vadd.f32 %v828_v40, %v798_v56  ;;  %v851_v0 = vmul.f32 %v798_v56, %v798_v56  ;;  %v799_v1 = vadd.f32 %v783_v46, %v751_v58  ;;  %v1197_v2 = vpop.f32.mrb[12].mxu0  ;;  %v1945_v4 = vadd.f32 %v791_v50, %v759_v60  ;;  %v1221_v5 = vpop.f32.mrb[12].mxu1 }
 0x184   : > { %v1198_v8 = vpop.f32.mrb[13].mxu0  ;;  %822 = vst [vmem:[%s1913_s29 + $0x60] sm:$0xff] %v1941_v61  ;;  %v1222_v10 = vpop.f32.mrb[13].mxu1 }
 0x185   : > { %v866_v11 = vadd.f32 %v865_v51, %v851_v0  ;;  %815 = vst [vmem:[%s1913_s29 + $0x28] sm:$0xff] %v799_v1  ;;  %v830_v12 = vadd.f32 %v829_v63, %v799_v1  ;;  %v852_v13 = vmul.f32 %v799_v1, %v799_v1  ;;  %v1199_v14 = vadd.f32 %v1198_v8, %v1197_v2  ;;  %v1200_v15 = vpop.f32.mrb[14].mxu0  ;;  %v1224_v16 = vpop.f32.mrb[14].mxu1 }
 0x186   : > { %823 = vst [vmem:[%s1913_s29 + $0x68] sm:$0xff] %v1945_v4  ;;  %v1201_v17 = vpop.f32.mrb[15].mxu0  ;;  %v1223_v19 = vadd.f32 %v1222_v10, %v1221_v5  ;;  %v1225_v21 = vpop.f32.mrb[15].mxu1 }
 0x187   : > { %v867_v23 = vadd.f32 %v866_v11, %v852_v13  ;;  %v752_v24 = vmul.f32 0.5, %v1199_v14  ;;  %v1202_v25 = vadd.f32 %v1201_v17, %v1200_v15  ;;  %v1226_v27 = vadd.f32 %v1225_v21, %v1224_v16 }
 0x188   : > { %v760_v28 = vmul.f32 0.5, %v1223_v19 }
 0x189   : > { %v800_v29 = vadd.f32 %v784_v9, %v752_v24  ;;  %v753_v30 = vmul.f32 0.5, %v1202_v25  ;;  %v761_v31 = vmul.f32 0.5, %v1226_v27 }
 0x18a   : > { %v1956_v33 = vadd.f32 %v792_v20, %v760_v28 }
 0x18b   : > { %816 = vst [vmem:[%s1913_s29 + $0x30] sm:$0xff] %v800_v29  ;;  %v831_v34 = vadd.f32 %v830_v12, %v800_v29  ;;  %v853_v35 = vmul.f32 %v800_v29, %v800_v29  ;;  %v801_v36 = vadd.f32 %v785_v18, %v753_v30  ;;  %v809_v37 = vadd.f32 %v793_v22, %v761_v31 }
 0x18c   : > { %824 = vst [vmem:[%s1913_s29 + $0x70] sm:$0xff] %v1956_v33 }
 0x18d   : > { %v868_v38 = vadd.f32 %v867_v23, %v853_v35  ;;  %817 = vst [vmem:[%s1913_s29 + $0x38] sm:$0xff] %v801_v36  ;;  %v832_v39 = vadd.f32 %v831_v34, %v801_v36  ;;  %v854_v40 = vmul.f32 %v801_v36, %v801_v36  ;;  %825 = vst [vmem:[%s1913_s29 + $0x78] sm:$0xff] %v809_v37 }
 0x18e   : > { %1478 = shalt.err (!%p1475_p11)
}
 0x18f   : > { %s1479_s12 = scalar_lea.hbm %s1961_s28, 2048  ;;  %s1483_s26 = scalar_lea.hbm %s2112_s3, 4096 }
 0x190   : > { %p1480_p9 = scmp.ne.s32.totalorder %s1961_s28, %s1479_s12  ;;  %p1484_p13 = scmp.lt.u32.totalorder %s1961_s28, %s2112_s3 }
 0x191   : > { %p1485_p10 = scmp.lt.u32.totalorder %s1483_s26, %s1479_s12  ;;  %p1487_p2 = scmp.lt.u32.totalorder %s1479_s12, %s1961_s28 }
 0x192   : > { %p1481_p8 = pnand %p1480_p9, %p2136_p7 }
 0x193   : > { %p1486_p1 = por %p1485_p10, %p1484_p13 }
 0x194   : > { %p1482_p6 = pneg %p1481_p8 }
 0x195   : > { %p1488_p12 = por %p1487_p2, %p1486_p1 }
 0x197   : > { %p1489_p0 = pnand %p1488_p12, %p1482_p6 }
 0x199   : > { %1492 = shalt.err (!%p1489_p0)
}
 0x19a   : > { %s1625_s16 = smov 128   ;;  %s1626_s15 = smov 8   ;;  %v855_v41 = vmul.f32 %v1910_v57, %v1910_v57  ;;  %v833_v42 = vadd.f32 %v832_v39, %v1910_v57  ;;  %v869_v43 = vadd.f32 %v868_v38, %v854_v40  ;;  %v856_v44 = vmul.f32 %v1919_v62, %v1919_v62 }
 0x19b   : > { %1251 = dma.vmem_to_hbm [thread:$0]  (%p2136_p7), %s1963_s17, 2048, %s1961_s28, %s887_s7, %s1625_s16, %s1625_s16, %s1626_s15   ;;  %v857_v47 = vmul.f32 %v1927_v26, %v1927_v26  ;;  %v858_v50 = vmul.f32 %v1931_v32, %v1931_v32  ;;  %v859_v53 = vmul.f32 %v1941_v61, %v1941_v61  ;;  %v860_v56 = vmul.f32 %v1945_v4, %v1945_v4 }
 0x19c   : > { %v834_v45 = vadd.f32 %v833_v42, %v1919_v62  ;;  %v870_v46 = vadd.f32 %v869_v43, %v855_v41  ;;  %s1155_s17 = sshll.u32 %s1607_s21, 4  ;;  %s321_s28 = scalar_lea.vmem [#allocation10], %s1864_s25 }
 0x19d   : > { %s924_s7 = sshll.u32 %s321_s28, 4  ;;  %s327_s13 = scalar_lea.vmem [#allocation12], %s1864_s25  ;;  %s2025_s7 = int_to_ptr.vmem [resolvable:$true] %s924_s7 }
 0x19e   : > { %v871_v48 = vadd.f32 %v870_v46, %v856_v44  ;;  %v835_v49 = vadd.f32 %v834_v45, %v1927_v26  ;;  %v861_v26 = vmul.f32 %v1956_v33, %v1956_v33  ;;  %s937_s12 = sshll.u32 %s327_s13, 4  ;;  %s2023_s26 = scalar_lea.hbm %s2113_s4, %s1155_s17  ;;  %s2032_s12 = int_to_ptr.vmem [resolvable:$true] %s937_s12 }
 0x19f   : > { %s2030_s11 = scalar_lea.hbm %s2114_s5, %s1155_s17  ;;  %s2036_s16 = scalar_lea.sflag [#allocation11], %s271_s10 }
 0x1a0   : > { %v836_v51 = vadd.f32 %v835_v49, %v1931_v32  ;;  %v872_v52 = vadd.f32 %v871_v48, %v857_v47  ;;  %s1493_s15 = scalar_lea.vmem %s2025_s7, 16  ;;  %s1627_s29 = smov [#allocation10]  }
 0x1a1   : > { %p1494_p3 = scmp.ne.s32.totalorder %s2025_s7, %s1493_s15  ;;  %s1497_s8 = sshll.u32 %s1627_s29, 4  ;;  %s1498_s8 = int_to_ptr.vmem [resolvable:$false] %s1497_s8 }
 0x1a2   : > { %v837_v57 = vadd.f32 %v836_v51, %v1941_v61  ;;  %v873_v54 = vadd.f32 %v872_v52, %v858_v50  ;;  %v862_v61 = vmul.f32 %v809_v37, %v809_v37  ;;  %p1500_p11 = scmp.lt.s32.totalorder %s2025_s7, %s1498_s8 }
 0x1a3   : > { %p1495_p4 = pnand %p1494_p3, %p2136_p7 }
 0x1a4   : > { %v874_v62 = vadd.f32 %v873_v54, %v859_v53  ;;  %v838_v55 = vadd.f32 %v837_v57, %v1945_v4 }
 0x1a5   : > { %p1496_p5 = pneg %p1495_p4 }
 0x1a6   : > { %v875_v58 = vadd.f32 %v874_v62, %v860_v56  ;;  %v839_v32 = vadd.f32 %v838_v55, %v1956_v33 }
 0x1a8   : > { %v876_v59 = vadd.f32 %v875_v58, %v861_v26  ;;  %v840_v60 = vadd.f32 %v839_v32, %v809_v37 }
 0x1aa   : > { %v841_v63 = vrot.slane %v840_v60, 4  ;;  %v877_v0 = vadd.f32 %v876_v59, %v862_v61 }
 0x1ac   : > { %v842_v1 = vadd.f32 %v841_v63, %v840_v60  ;;  %v878_v2 = vrot.slane %v877_v0, 4 }
 0x1ae   : > { %v843_v3 = vrot.slane %v842_v1, 2  ;;  %v879_v5 = vadd.f32 %v878_v2, %v877_v0 }
 0x1b0   : > { %v844_v6 = vadd.f32 %v843_v3, %v842_v1  ;;  %v880_v4 = vrot.slane %v879_v5, 2 }
 0x1b2   : > { %v881_v7 = vadd.f32 %v880_v4, %v879_v5  ;;  %v845_v8 = vrot.slane %v844_v6, 1 }
 0x1b4   : > { %v846_v9 = vadd.f32 %v845_v8, %v844_v6  ;;  %v882_v10 = vrot.slane %v881_v7, 1 }
 0x1b6   : > { %884 = vst [vmem:[%s321_s28] sm:$0x1] %v846_v9  ;;  %v883_v11 = vadd.f32 %v882_v10, %v881_v7  ;;  %s1499_s28 = scalar_lea.vmem %s1498_s8, 32 }
 0x1b7   : > { %p1501_p9 = scmp.lt.s32.totalorder %s1499_s28, %s1493_s15 }
 0x1b9   : > { %p1502_p8 = por %p1501_p9, %p1500_p11 }
 0x1bb   : > { %p1503_p6 = pnand %p1502_p8, %p1496_p5 }
 0x1bd   : > { %1506 = shalt.err (!%p1503_p6)
}
 0x1be   : > { %s1507_s27 = scalar_lea.hbm %s2023_s26, 16  ;;  %s1511_s21 = scalar_lea.hbm %s2113_s4, 32 }
 0x1bf   : > { %p1508_p13 = scmp.ne.s32.totalorder %s2023_s26, %s1507_s27  ;;  %p1512_p2 = scmp.lt.u32.totalorder %s2023_s26, %s2113_s4 }
 0x1c0   : > { %p1513_p12 = scmp.lt.u32.totalorder %s1511_s21, %s1507_s27  ;;  %p1515_p3 = scmp.lt.u32.totalorder %s1507_s27, %s2023_s26 }
 0x1c1   : > { %p1509_p10 = pnand %p1508_p13, %p2136_p7 }
 0x1c2   : > { %p1514_p0 = por %p1513_p12, %p1512_p2 }
 0x1c3   : > { %p1510_p1 = pneg %p1509_p10 }
 0x1c4   : > { %p1516_p4 = por %p1515_p3, %p1514_p0 }
 0x1c6   : > { %p1517_p5 = pnand %p1516_p4, %p1510_p1 }
 0x1c8   : > { %1520 = shalt.err (!%p1517_p5)
}
 0x1c9   : > { %1252 = dma.vmem_to_hbm [thread:$0]  (%p2136_p7), %s2025_s7, 16, %s2023_s26, %s2036_s16   ;;  %885 = vst [vmem:[%s327_s13] sm:$0x1] %v883_v11 }
 0x1ca   : > { %s1521_s15 = scalar_lea.vmem %s2032_s12, 16  ;;  %s1628_s8 = smov [#allocation12]  }
 0x1cb   : > { %p1522_p11 = scmp.ne.s32.totalorder %s2032_s12, %s1521_s15  ;;  %s1525_s28 = sshll.u32 %s1628_s8, 4  ;;  %s1526_s28 = int_to_ptr.vmem [resolvable:$false] %s1525_s28 }
 0x1cc   : > { %s1527_s27 = scalar_lea.vmem %s1526_s28, 32  ;;  %p1528_p6 = scmp.lt.s32.totalorder %s2032_s12, %s1526_s28 }
 0x1cd   : > { %p1523_p9 = pnand %p1522_p11, %p2136_p7  ;;  %p1529_p13 = scmp.lt.s32.totalorder %s1527_s27, %s1521_s15 }
 0x1cf   : > { %p1524_p8 = pneg %p1523_p9  ;;  %p1530_p10 = por %p1529_p13, %p1528_p6 }
 0x1d1   : > { %p1531_p1 = pnand %p1530_p10, %p1524_p8 }
 0x1d3   : > { %1534 = shalt.err (!%p1531_p1)
}
 0x1d4   : > { %s1535_s25 = scalar_lea.hbm %s2030_s11, 16  ;;  %s1539_s26 = scalar_lea.hbm %s2114_s5, 32 }
 0x1d5   : > { %p1536_p2 = scmp.ne.s32.totalorder %s2030_s11, %s1535_s25  ;;  %p1540_p3 = scmp.lt.u32.totalorder %s2030_s11, %s2114_s5 }
 0x1d6   : > { %p1541_p4 = scmp.lt.u32.totalorder %s1539_s26, %s1535_s25  ;;  %p1543_p11 = scmp.lt.u32.totalorder %s1535_s25, %s2030_s11 }
 0x1d7   : > { %p1537_p12 = pnand %p1536_p2, %p2136_p7 }
 0x1d8   : > { %p1542_p5 = por %p1541_p4, %p1540_p3 }
 0x1d9   : > { %p1538_p0 = pneg %p1537_p12 }
 0x1da   : > { %p1544_p9 = por %p1543_p11, %p1542_p5 }
 0x1dc   : > { %p1545_p8 = pnand %p1544_p9, %p1538_p0 }
 0x1de   : > { %1548 = shalt.err (!%p1545_p8)
}
 0x1df   : > { %1253 = dma.vmem_to_hbm [thread:$0]  (%p2136_p7), %s2032_s12, 16, %s2030_s11, %s2036_s16  }
 0x1e0 PF: > { %s949_s21 = sand.u32 1, %s1595_s18   ;;  %p2137_p6 = scmp.ne.s32.totalorder %s2125_s9, 0 }
 0x1e1   : > { %p2138_p13 = scmp.ge.s32.totalorder %s1615_s23, 2  ;;  %s950_s14 = scalar_lea.sflag [#allocation5], %s949_s21 }
 0x1e3   : > { %p1269_p10 = pnand %p2138_p13, %p2137_p6 }
 0x1e5   : > { %1586 = dma.done.wait (!%p1269_p10), %s950_s14, 2048  }
 0x1e6   : > { %1588 = vsyncadd (!%p1269_p10), %s950_s14, 4294965248  ;;  %s2139_s29 = sadd.s32 4294967294, %s1615_s23  }
 0x1e7   : > { %s958_s15 = sand.u32 1, %s2139_s29  }
 0x1e8   : > { %s959_s8 = scalar_lea.sflag [#allocation11], %s958_s15 }
 0x1e9   : > { %1590 = dma.done.wait (!%p1269_p10), %s959_s8, 32  }
 0x1ea   : > { %1592 = vsyncadd (!%p1269_p10), %s959_s8, 4294967264  ;;  %s26_s23 = sadd.s32 1, %s1615_s23   ;;  %s2140_s18 = smov %s1599_s19 }
 0x1eb   : > { %p23_p7 = scmp.ge.s32.totalorder %s26_s23, 4   ;;  %s2141_s19 = smov %s1603_s20 }
 0x1ec   : > { %s2142_s20 = smov %s1707_s30  ;;  %s2143_s21 = smov %s1611_s22 }
 0x1ed   : > { %s2144_s22 = smov %s2146_s24  ;;  %25 = sbr.rel (!%p23_p7) target bundleno = 9 (0x9), region = 133 }
 0x1f4   :  { %971 = vsyncpa [#allocation4], 1 }
 0x1f5   :  { %973 = vsyncpa [#allocation4 + $0x1], 1 }
 0x1f6   :  { %974 = vsyncpa [#allocation7], 1 }
 0x1f7   :  { %975 = vsyncpa [#allocation5], 1 }
 0x1f8   :  { %977 = vsyncpa [#allocation5 + $0x1], 1 }
 0x1f9   :  { %978 = vsyncpa [#allocation11], 1 }
 0x1fa   :  { %980 = vsyncpa [#allocation11 + $0x1], 1 }

</bundles_post_ra>
